<compile_context>
chip_gen: v7x
topology: tpu7x:2x2x1
jax: 0.10.0
libtpu: 0.0.40
codegen_flags: <defaults>
</compile_context>

<pallas_src>
import jax
import jax.numpy as jnp
from jax import lax
from jax.experimental import pallas as pl
from jax.experimental.pallas import tpu as pltpu


def _round_up(x, m):
    return ((x + m - 1) // m) * m


def _cdiv(a, b):
    return -(-a // b)


# ---------------------------------------------------------------------------
# Kernel: out_rows = rsqrt(max(rowsum(A), 1)) * (A @ xw)
#   grid = (row tiles, K tiles); K (reduction) axis is last.
#   a_ref  : (tm, tk)    int8   0/1 adjacency tile streamed from HBM
#   xw_ref : (tk, 2c+1)  bf16   [xw_hi | xw_lo | ones]; the ones column makes
#                               the same dot accumulate the in-degree in f32.
#   acc_ref: (tm, 2c+1)  f32    VMEM accumulator, resident across K.
# ---------------------------------------------------------------------------
def _agg_kernel(a_ref, xw_ref, o_ref, acc_ref):
    k = pl.program_id(1)

    @pl.when(k == 0)
    def _():
        acc_ref[...] = jnp.zeros_like(acc_ref)

    # int8 -> bf16 convert uses otherwise-idle VPU slots; never upcast the
    # big operand to f32.  MXU: bf16 x bf16 with f32 accumulation.
    a_bf = a_ref[...].astype(jnp.bfloat16)
    acc_ref[...] += jnp.dot(a_bf, xw_ref[...],
                            preferred_element_type=jnp.float32)

    @pl.when(k == pl.num_programs(1) - 1)
    def _():
        c = o_ref.shape[-1]
        acc = acc_ref[...]
        agg = acc[:, :c] + acc[:, c:2 * c]                 # hi + lo parts
        deg = jnp.maximum(acc[:, 2 * c:2 * c + 1], 1.0)    # fused in-degree
        o_ref[...] = lax.rsqrt(deg) * agg                  # padded rows -> 0


def gcn_forward(a, x, w, b, *, tm=None, tk=None):
    """DGL GraphConv(norm='both') forward: D_in^-1/2 A D_out^-1/2 X W + b."""
    n, _ = x.shape
    c = w.shape[1]

    # ---- tile sizes: large tiles, independent row/col padding, >=2 row tiles
    if tm is None:
        rows8 = _round_up(n, 8)
        nt = max(2, _cdiv(rows8, 1024))          # >=2 row tiles (v7x 2nd TC)
        tm = min(1024, _round_up(_cdiv(rows8, nt), 8))
    if tk is None:
        cols128 = _round_up(n, 128)
        nt = max(1, _cdiv(cols128, 4096))
        tk = min(4096, _round_up(_cdiv(cols128, nt), 128))
    assert tm % 8 == 0 and tk % 128 == 0
    rows_pad = _round_up(n, tm)
    cols_pad = _round_up(n, tk)

    # ---- XLA prologue (cheap): out-degree norm + tiny feature transform ----
    a_i8 = a.astype(jnp.int8)                                 # exact for 0/1 A
    out_deg = jnp.sum(a_i8, axis=0, dtype=jnp.int32).astype(jnp.float32)
    out_norm = lax.rsqrt(jnp.maximum(out_deg, 1.0)).reshape(n, 1)

    xw = (out_norm * x.astype(jnp.float32)) @ w.astype(jnp.float32)   # (n, c)
    xw_hi = xw.astype(jnp.bfloat16)
    xw_lo = (xw - xw_hi.astype(jnp.float32)).astype(jnp.bfloat16)
    ones = jnp.ones((n, 1), jnp.bfloat16)
    xw_aug = jnp.concatenate([xw_hi, xw_lo, ones], axis=1)            # (n, 2c+1)

    a_p = jnp.pad(a_i8, ((0, rows_pad - n), (0, cols_pad - n)))
    xw_p = jnp.pad(xw_aug, ((0, cols_pad - n), (0, 0)))

    out = pl.pallas_call(
        _agg_kernel,
        out_shape=jax.ShapeDtypeStruct((rows_pad, c), jnp.float32),
        grid=(rows_pad // tm, cols_pad // tk),
        in_specs=[
            pl.BlockSpec((tm, tk), lambda i, k: (i, k)),          # A tile (int8)
            pl.BlockSpec((tk, 2 * c + 1), lambda i, k: (k, 0)),   # xw K-slice
        ],
        out_specs=pl.BlockSpec((tm, c), lambda i, k: (i, 0)),
        scratch_shapes=[pltpu.VMEM((tm, 2 * c + 1), jnp.float32)],
        compiler_params=pltpu.CompilerParams(
            dimension_semantics=("parallel", "arbitrary"),
            vmem_limit_bytes=32 * 1024 * 1024),
    )(a_p, xw_p)

    # Bias added once, after slicing off the (all-zero) padded rows.
    return out[:n, :] + jnp.asarray(b, jnp.float32).reshape(1, c)


def gcn_reference(a, x, w, b):
    in_deg = jnp.maximum(jnp.sum(a, axis=1, keepdims=True), 1.0)
    out_deg = jnp.maximum(jnp.sum(a, axis=0, keepdims=True), 1.0)
    a_norm = a * (in_deg ** -0.5) * (out_deg ** -0.5)
    return a_norm @ (x @ w) + jnp.asarray(b, jnp.float32).reshape(1, -1)


if __name__ == "__main__":
    N = 16              # number of graph nodes
    NUM_FEATURES = 8    # arg.num_features
    C_OUT = 2           # GraphConv(arg.num_features, 2)

    key = jax.random.PRNGKey(0)
    kx, kw, ka, kx2 = jax.random.split(key, 4)

    # Node features.
    x = jax.random.normal(kx, (N, NUM_FEATURES), dtype=jnp.float32)

    # Deterministic undirected ring graph with self-loops (dense adjacency).
    idx = jnp.arange(N)
    a = (jnp.zeros((N, N), jnp.float32)
         .at[idx, idx].set(1.0)
         .at[idx, (idx + 1) % N].set(1.0)
         .at[idx, (idx - 1) % N].set(1.0))

    # GraphConv parameters (Glorot-style init for W, zeros for bias).
    limit = (6.0 / (NUM_FEATURES + C_OUT)) ** 0.5
    w = jax.random.uniform(kw, (NUM_FEATURES, C_OUT), dtype=jnp.float32,
                           minval=-limit, maxval=limit)
    b = jnp.zeros((1, C_OUT), dtype=jnp.float32)

    out = jax.block_until_ready(gcn_forward(a, x, w, b))
    ref = gcn_reference(a, x, w, b)
    assert out.shape == (N, C_OUT)
    assert jnp.allclose(out, ref, atol=1e-4, rtol=1e-4)

    # Non-multiple N exercises independent row/col padding and 2 row tiles.
    N2 = 200
    x2 = jax.random.normal(kx2, (N2, NUM_FEATURES), dtype=jnp.float32)
    a2 = (jax.random.uniform(ka, (N2, N2)) < 0.05).astype(jnp.float32)
    out2 = jax.block_until_ready(gcn_forward(a2, x2, w, b))
    ref2 = gcn_reference(a2, x2, w, b)
    assert jnp.allclose(out2, ref2, atol=1e-4, rtol=1e-4)

    # Forced small tiles exercise the multi-step K reduction (grid (4, 2)),
    # the VMEM accumulator and the fused in-degree finalize.
    out3 = jax.block_until_ready(gcn_forward(a2, x2, w, b, tm=64, tk=128))
    assert jnp.allclose(out3, ref2, atol=1e-4, rtol=1e-4)

    print("KERNEL_OK")
</pallas_src>

<mosaic_0001>
module attributes {stable_mosaic.version = 11 : i64} {
  func.func @_agg_kernel(%arg0: i32, %arg1: i32, %arg2: memref<8x128xi8, #tpu.memory_space<vmem>>, %arg3: memref<128x5xbf16, #tpu.memory_space<vmem>>, %arg4: memref<8x2xf32, #tpu.memory_space<vmem>>, %arg5: memref<8x5xf32, #tpu.memory_space<vmem>>) attributes {dimension_semantics = [#tpu.dimension_semantics<parallel>, #tpu.dimension_semantics<arbitrary>], iteration_bounds = array<i64: 2, 1>, scalar_prefetch = 0 : i64, scratch_operands = 1 : i64, tpu.core_type = #tpu.core_type<tc>, window_params = [{transform_indices = @transform_0, window_bounds = array<i64: 8, 128>}, {transform_indices = @transform_1, window_bounds = array<i64: 128, 5>}, {transform_indices = @transform_2, window_bounds = array<i64: 8, 2>}]} {
    %c0_i32 = arith.constant 0 : i32
    %0 = arith.cmpi eq, %arg1, %c0_i32 : i32
    %1 = arith.extui %0 : i1 to i32
    %c0_i32_0 = arith.constant 0 : i32
    %2 = arith.cmpi ne, %1, %c0_i32_0 : i32
    scf.if %2 {
      %cst_10 = arith.constant 0.000000e+00 : f32
      %13 = vector.broadcast %cst_10 : f32 to vector<8x5xf32>
      %c0_11 = arith.constant 0 : index
      %c0_12 = arith.constant 0 : index
      %14 = vector.load %arg5[%c0_11, %c0_12] : memref<8x5xf32, #tpu.memory_space<vmem>>, vector<8x5xf32>
      tpu.vector_store %arg5[%c0_11, %c0_12], %13 {strides = array<i32>} : memref<8x5xf32, #tpu.memory_space<vmem>>, vector<8x5xf32>,
    } else {
    }
    %c0 = arith.constant 0 : index
    %c0_1 = arith.constant 0 : index
    %3 = vector.load %arg2[%c0, %c0_1] : memref<8x128xi8, #tpu.memory_space<vmem>>, vector<8x128xi8>
    %4 = arith.sitofp %3 : vector<8x128xi8> to vector<8x128xbf16>
    %c0_2 = arith.constant 0 : index
    %c0_3 = arith.constant 0 : index
    %5 = vector.load %arg5[%c0_2, %c0_3] : memref<8x5xf32, #tpu.memory_space<vmem>>, vector<8x5xf32>
    %c0_4 = arith.constant 0 : index
    %c0_5 = arith.constant 0 : index
    %6 = vector.load %arg3[%c0_4, %c0_5] : memref<128x5xbf16, #tpu.memory_space<vmem>>, vector<128x5xbf16>
    %cst = arith.constant dense<0.000000e+00> : vector<8x5xf32>
    %7 = tpu.matmul %4, %6, %cst {dimension_numbers = #tpu.dot_dimension_numbers<[1], [0], [0], [1], [0, 0, 1, 1], [], []>} : vector<8x128xbf16>, vector<128x5xbf16>, vector<8x5xf32> -> vector<8x5xf32>
    %8 = arith.addf %5, %7 : vector<8x5xf32>
    %c0_6 = arith.constant 0 : index
    %c0_7 = arith.constant 0 : index
    %9 = vector.load %arg5[%c0_6, %c0_7] : memref<8x5xf32, #tpu.memory_space<vmem>>, vector<8x5xf32>
    tpu.vector_store %arg5[%c0_6, %c0_7], %8 {strides = array<i32>} : memref<8x5xf32, #tpu.memory_space<vmem>>, vector<8x5xf32>,
    %c0_i32_8 = arith.constant 0 : i32
    %10 = arith.cmpi eq, %arg1, %c0_i32_8 : i32
    %11 = arith.extui %10 : i1 to i32
    %c0_i32_9 = arith.constant 0 : i32
    %12 = arith.cmpi ne, %11, %c0_i32_9 : i32
    scf.if %12 {
      %c0_10 = arith.constant 0 : index
      %c0_11 = arith.constant 0 : index
      %13 = vector.load %arg5[%c0_10, %c0_11] : memref<8x5xf32, #tpu.memory_space<vmem>>, vector<8x5xf32>
      %14 = vector.extract_strided_slice %13 {offsets = [0, 0], sizes = [8, 2], strides = [1, 1]} : vector<8x5xf32> to vector<8x2xf32>
      %15 = vector.extract_strided_slice %13 {offsets = [0, 2], sizes = [8, 2], strides = [1, 1]} : vector<8x5xf32> to vector<8x2xf32>
      %16 = arith.addf %14, %15 : vector<8x2xf32>
      %17 = vector.extract_strided_slice %13 {offsets = [0, 4], sizes = [8, 1], strides = [1, 1]} : vector<8x5xf32> to vector<8x1xf32>
      %cst_12 = arith.constant 1.000000e+00 : f32
      %18 = vector.broadcast %cst_12 : f32 to vector<8x1xf32>
      %19 = arith.maximumf %17, %18 : vector<8x1xf32>
      %20 = math.rsqrt %19 : vector<8x1xf32>
      %21 = vector.broadcast %20 : vector<8x1xf32> to vector<8x2xf32>
      %22 = arith.mulf %21, %16 : vector<8x2xf32>
      %c0_13 = arith.constant 0 : index
      %c0_14 = arith.constant 0 : index
      %23 = vector.load %arg4[%c0_13, %c0_14] : memref<8x2xf32, #tpu.memory_space<vmem>>, vector<8x2xf32>
      tpu.vector_store %arg4[%c0_13, %c0_14], %22 {strides = array<i32>} : memref<8x2xf32, #tpu.memory_space<vmem>>, vector<8x2xf32>,
    } else {
    }
    return
  }
  func.func @transform_0(%arg0: i32, %arg1: i32) -> (i32, i32) {
    %c0_i32 = arith.constant 0 : i32
    return %arg0, %arg1 : i32, i32
  }
  func.func @transform_1(%arg0: i32, %arg1: i32) -> (i32, i32) {
    %c0_i32 = arith.constant 0 : i32
    %c0_i32_0 = arith.constant 0 : i32
    return %arg1, %c0_i32 : i32, i32
  }
  func.func @transform_2(%arg0: i32, %arg1: i32) -> (i32, i32) {
    %c0_i32 = arith.constant 0 : i32
    %c0_i32_0 = arith.constant 0 : i32
    return %arg0, %c0_i32 : i32, i32
  }
}

</mosaic_0001>

<bundles_post_ra>
// kernel: tpu_custom_call.1
= control target key start
LH: loop header
LB: loop body
LE: loop exit
PB: predicated region body
PF: predicated region fallthrough
CT: control target
= control target key end

     0   :  { %s529_s9 = smov 0   ;;  %s531_s10 = smov 0   ;;  %s596_s0 = inlined_call_operand.vmem [shape: s8[16,128], index: 0, kind: input, shape index: {}]   ;;  %s597_s1 = inlined_call_operand.vmem [shape: bf16[128,5], index: 1, kind: input, shape index: {}]   ;;  %s598_s2 = inlined_call_operand.vmem [shape: f32[16,2], index: 2, kind: output, shape index: {}]  }
   0x1   :  { %s533_s11 = smov 0  }
   0x2 LB: > { %s24_s12 = sadd.s32 1, %s504_s10  ;;  %p405_p0 = scmp.ge.s32.totalorder %s508_s11, 1  ;;  %s508_s11 = sphi %s533_s11, %s12_s11   ;;  %s504_s10 = sphi %s531_s10, %s600_s10   ;;  %s500_s9 = sphi %s529_s9, %s599_s9  }
   0x3   : > { %p26_p1 = scmp.ge.s32.totalorder %s24_s12, 2  ;;  %p139_p2 = scmp.lt.s32.totalorder %s508_s11, 3 }
   0x5   : > { %s602_s12 = smov (%p26_p1, %s24_s12), 0  ;;  %p140_p3 = pnand %p405_p0, %p139_p2 }
   0x6   : > { %v476_v0 = vld [vmem:[%s597_s1] sm:$0xff] (!%p140_p3)   ;;  %v510_v1 = vmov (!%p140_p3), 0.0   ;;  %v477_v2 = vld [vmem:[%s597_s1 + $0x8] sm:$0xff] (!%p140_p3)   ;;  %vm511_vm0 = vmmov (!%p140_p3), 0   ;;  %vm189_vm1 = vcmask (!%p140_p3), 39936   ;;  %v478_v3 = vld [vmem:[%s597_s1 + $0x10] sm:$0xff] (!%p140_p3)  }
   0x7   : > { %143 = sbr.rel (%p140_p3) target bundleno = 411 (0x19b), region = 28  ;;  %427 = vmatprep.subr.bf16.mxu0 (!%p140_p3), %v510_v1  ;;  %443 = vmatprep.mubr.msk.bf16.mxu0 (!%p140_p3), %vm511_vm0, %v510_v1  ;;  %190 = vst.msk [vmem:[#allocation2] sm:$0xff] (!%p140_p3), %vm189_vm1, %v510_v1  ;;  %v479_v4 = vld [vmem:[%s597_s1 + $0x18] sm:$0xff] (!%p140_p3)   ;;  %p167_p4 = scmp.lt.s32.totalorder (!%p140_p3), %s500_s9, 1  ;;  %v480_v5 = vld [vmem:[%s597_s1 + $0x20] sm:$0xff] (!%p140_p3)   ;;  %v481_v6 = vld [vmem:[%s597_s1 + $0x28] sm:$0xff] (!%p140_p3)  }
   0x8   : > { %428 = vmatpush3.bf16.msra.mxu0 (!%p140_p3), %v476_v0  ;;  %v482_v7 = vld [vmem:[%s597_s1 + $0x30] sm:$0xff] (!%p140_p3)   ;;  %v483_v8 = vld [vmem:[%s597_s1 + $0x38] sm:$0xff] (!%p140_p3)   ;;  %v512_v11 = vmov (!%p140_p3), 4   ;;  %s513_s5 = smov (!%p140_p3), 126   ;;  %vm318_vm2 = vcmask (!%p140_p3), 15360  }
   0x9   : > { %429 = vmatprep.subr.bf16.mxu0 (!%p140_p3), %v510_v1  ;;  %475 = vset.pattern.permute.xlu0 (!%p140_p3), %v512_v11 }
   0xc   : > { %430 = vmatpush3.bf16.msra.mxu0 (!%p140_p3), %v477_v2 }
   0xd   : > { %431 = vmatprep.subr.bf16.mxu0 (!%p140_p3), %v510_v1 }
   0xe   : > { %s604_s9 = smov (!%p167_p4, %s500_s9), 1  ;;  %v193_v12 = vld [vmem:[#allocation2] sm:$0xff] }
   0xf   : > { %s406_s25 = sshll.u32 %s604_s9, 1  ;;  %s407_s6 = sshll.u32 %s604_s9, 3 }
  0x10   : > { %432 = vmatpush3.bf16.msra.mxu0 %v478_v3  ;;  %s173_s30 = scalar_lea.vmem %s596_s0, %s406_s25  ;;  %s183_s13 = scalar_lea.vmem %s598_s2, %s407_s6 }
  0x11   : > { %433 = vmatprep.subr.bf16.mxu0 %v510_v1  ;;  %v191_v9 = vld [vmem:[%s173_s30] sm:$0x3] }
  0x12   : > { %v192_v10 = vunpack.c.l.s8.bf16 %v191_v9 }
  0x14   : > { %434 = vmatpush3.bf16.msra.mxu0 %v479_v4 }
  0x15   : > { %435 = vmatprep.subr.bf16.mxu0 %v510_v1 }
  0x18   : > { %436 = vmatpush3.bf16.msra.mxu0 %v480_v5 }
  0x19   : > { %437 = vmatprep.subr.bf16.mxu0 %v510_v1 }
  0x1c   : > { %438 = vmatpush3.bf16.msra.mxu0 %v481_v6 }
  0x1d   : > { %439 = vmatprep.subr.bf16.mxu0 %v510_v1 }
  0x20   : > { %440 = vmatpush3.bf16.msra.mxu0 %v482_v7 }
  0x21   : > { %441 = vmatprep.subr.bf16.mxu0 %v510_v1 }
  0x24   : > { %442 = vmatpush3.bf16.msra.mxu0 %v483_v8 }
  0x27   : > { %444 = vmatmul.mubr.bf16.vlgmr.msra.gmra.mrb[0].mxu0 %v192_v10 }
  0xfa   : > { %v292_v13 = vpop.f32.mrb[0].mxu0 }
  0xfb   : > { %v298_v14 = vadd.f32 %v292_v13, %v193_v12  ;;  %v445_v15 = vpop.f32.mrb[1].mxu0 }
  0xfc   : > { %v295_v16 = vpop.f32.mrb[2].mxu0 }
  0xfd   : > { %300 = vst.msk [vmem:[#allocation2] sm:$0xff] %vm189_vm1, %v298_v14  ;;  %v446_v17 = vpop.f32.mrb[3].mxu0 }
 0x104   : > { %v304_v18 = vld [vmem:[#allocation2] sm:$0xff] }
 0x105   : > { %v310_v19 = vmax.f32 %v304_v18, 1.0 }
 0x107   : > { %484 = vrsqrt.f32 %v310_v19 }
 0x111   : > { %v485_v20 = vpop.eup %484 }
 0x112   : > { %314 = vperm.xlu0 %475, %v485_v20  }
 0x116   : > { %306 = vrot.lane.b32.xlu0 %v304_v18, %s513_s5 }
 0x191   : > { %v315_v21 = vpop.permute.xlu0 %314 }
 0x195   : > { %v307_v22 = vpop.permute.xlu0 %306 }
 0x196   : > { %v309_v23 = vadd.f32 %v307_v22, %v304_v18 }
 0x198   : > { %v317_v24 = vmul.f32 %v315_v21, %v309_v23 }
 0x19a   : > { %319 = vst.msk [vmem:[%s183_s13] sm:$0xff] %vm318_vm2, %v317_v24 }
 0x19b PF: > { %s12_s11 = sadd.s32 1, %s508_s11   ;;  %s599_s9 = smov %s504_s10 }
 0x19c   : > { %p9_p5 = scmp.ge.s32.totalorder %s12_s11, 4   ;;  %s600_s10 = smov %s602_s12 }
 0x19e   :  { %11 = sbr.rel (!%p9_p5) target bundleno = 2 (0x2), region = 69 }

</bundles_post_ra>
